<compile_context>
chip_gen: v7x
topology: tpu7x:2x2x1
jax: 0.10.0
libtpu: 0.0.40
codegen_flags: <defaults>
</compile_context>

<pallas_src>
import functools

import jax
import jax.numpy as jnp
from jax.experimental import pallas as pl
from jax.experimental.pallas import tpu as pltpu

_LANES = 128
_CAP = 10000.0
_TARGET_BLOCK_BYTES = 2 * 1024 * 1024   # per input, per pipeline buffer
_CHUNK_ROWS = 512                       # in-kernel sub-chunk (bounds f32 temps)


# --------------------------------------------------------------------------
# beta specialization
# --------------------------------------------------------------------------
def _int_pow(x, n):
    """x**n for integer n >= 1 using multiplies only (exp-by-squaring)."""
    result = None
    base = x
    while True:
        if n & 1:
            result = base if result is None else result * base
        n >>= 1
        if n == 0:
            return result
        base = base * base


def _apply_power(x, beta):
    """x ** beta for x >= 0, avoiding jnp.power (EUP exp+log) when possible."""
    if beta == 0.0:
        return jnp.ones_like(x)
    if beta == 1.0:
        return x
    twice = beta * 2.0
    if float(twice).is_integer() and 0.0 < beta <= 8.0:
        n2 = int(round(twice))          # beta == n2 / 2
        out = None
        if n2 // 2 > 0:
            out = _int_pow(x, n2 // 2)  # VALU multiplies only
        if n2 % 2 == 1:
            s = jnp.sqrt(x)             # single EUP op
            out = s if out is None else out * s
        return out
    return jnp.power(x, jnp.float32(beta))  # general fallback (exp + log)


# --------------------------------------------------------------------------
# Pallas kernel: per-block (8, 128) partial sums
# --------------------------------------------------------------------------
def _mae_partial_kernel(x_ref, y_ref, out_ref, *, beta, chunk_rows):
    """Partial sums of clamp(|x - y|, max=10000) ** beta over one block.

    x_ref / y_ref: (block_rows, 128) tiles in the inputs' native dtype.
    out_ref:       (1, 8, 128) f32 vreg-granule partial sums for this block.
    """
    block_rows = x_ref.shape[0]
    nchunks = block_rows // chunk_rows

    def chunk_partial(start):
        xs = x_ref[pl.ds(start, chunk_rows), :].astype(jnp.float32)
        ys = y_ref[pl.ds(start, chunk_rows), :].astype(jnp.float32)
        capped = jnp.minimum(jnp.abs(xs - ys), jnp.float32(_CAP))
        powed = _apply_power(capped, beta)
        # Fold only across vreg granules (pure VALU adds, no XLU sublane fold).
        return jnp.sum(powed.reshape(chunk_rows // 8, 8, _LANES), axis=0)

    if nchunks == 1:
        acc = chunk_partial(0)
    else:
        def body(c, acc):
            start = pl.multiple_of(c * chunk_rows, chunk_rows)
            return acc + chunk_partial(start)

        acc = jax.lax.fori_loop(
            0, nchunks, body, jnp.zeros((8, _LANES), jnp.float32)
        )

    out_ref[...] = acc.reshape(1, 8, _LANES)


def _choose_block_rows(rows, itemsize):
    """Dtype-aware block sizing with a >=4-block cap for v7x megacore."""
    if rows < 8:
        return 0
    target = max(8, _TARGET_BLOCK_BYTES // (_LANES * itemsize))  # 4096 f32 / 8192 bf16
    cap = max(8, pl.cdiv(rows, 4))     # keep >= 4 grid blocks (2 per TC on v7x)
    br = min(target, cap, rows)
    if br >= _CHUNK_ROWS:
        br = (br // _CHUNK_ROWS) * _CHUNK_ROWS   # whole in-kernel chunks
    else:
        br = (br // 8) * 8                       # sublane-granule aligned
    return br


def _lane_partial_sums(x2, y2, beta, block_rows, num_blocks):
    """(rows, 128) native-dtype slabs -> (num_blocks, 8, 128) f32 partials."""
    chunk_rows = min(block_rows, _CHUNK_ROWS)
    assert block_rows % chunk_rows == 0 and chunk_rows % 8 == 0

    kernel = functools.partial(
        _mae_partial_kernel, beta=float(beta), chunk_rows=chunk_rows
    )
    return pl.pallas_call(
        kernel,
        out_shape=jax.ShapeDtypeStruct((num_blocks, 8, _LANES), jnp.float32),
        grid_spec=pltpu.PrefetchScalarGridSpec(
            num_scalar_prefetch=0,
            grid=(num_blocks,),
            in_specs=[
                pl.BlockSpec((block_rows, _LANES), lambda i: (i, 0)),
                pl.BlockSpec((block_rows, _LANES), lambda i: (i, 0)),
            ],
            out_specs=pl.BlockSpec((1, 8, _LANES), lambda i: (i, 0, 0)),
        ),
        compiler_params=pltpu.CompilerParams(
            # No carried state between steps -> fully parallel grid axis
            # (lets v7x megacore split the loop across its 2 TensorCores).
            dimension_semantics=("parallel",),
            # Raise v5e's 16 MiB scoped default; 48 MiB is safe on v7x too.
            vmem_limit_bytes=48 * 1024 * 1024,
        ),
    )(x2, y2)


# --------------------------------------------------------------------------
# Public wrapper
# --------------------------------------------------------------------------
def custom_mae_loss(inputs, targets, alpha=1.0, beta=1.0):
    """Pallas-TPU equivalent of CustomMAELoss.forward. Returns a scalar f32."""
    assert inputs.shape == targets.shape
    alpha = float(alpha)
    beta = float(beta)

    x = jnp.ravel(inputs)   # native dtype; cast happens after load in the kernel
    y = jnp.ravel(targets)
    n = x.shape[0]
    if n == 0:
        return jnp.float32(float("nan"))  # matches torch.mean of an empty tensor

    total = jnp.float32(0.0)
    covered = 0

    # Lane-aligned bulk through the Pallas kernel (zero-copy reshape view).
    if n % _LANES == 0:
        rows = n // _LANES
        itemsize = max(jnp.dtype(x.dtype).itemsize, jnp.dtype(y.dtype).itemsize)
        block_rows = _choose_block_rows(rows, itemsize)
        if block_rows:
            num_blocks = rows // block_rows
            if num_blocks > 0:
                x2 = x.reshape(rows, _LANES)   # free bitcast of the flat array
                y2 = y.reshape(rows, _LANES)
                partials = _lane_partial_sums(x2, y2, beta, block_rows, num_blocks)
                total = total + jnp.sum(partials, dtype=jnp.float32)
                covered = num_blocks * block_rows * _LANES

    # Remainder (< one block of leftover rows), or full fallback for
    # non-lane-aligned element counts.  One fused XLA expression that reads
    # the inputs exactly once -- avoids the ~3x-HBM prefix-slice copy that a
    # kernel-fed slice would force on misaligned tensors.
    if covered < n:
        tx = jax.lax.slice(x, (covered,), (n,)).astype(jnp.float32)
        ty = jax.lax.slice(y, (covered,), (n,)).astype(jnp.float32)
        tcap = jnp.minimum(jnp.abs(tx - ty), jnp.float32(_CAP))
        total = total + jnp.sum(_apply_power(tcap, beta), dtype=jnp.float32)

    # alpha and the mean's 1/N are hoisted out of the per-element work.
    return jnp.float32(alpha) * total / jnp.float32(n)


def _ref_loss(inputs, targets, alpha, beta):
    x = inputs.astype(jnp.float32)
    y = targets.astype(jnp.float32)
    capped = jnp.minimum(jnp.abs(x - y), _CAP)
    return jnp.mean(alpha * capped ** beta)


if __name__ == "__main__":
    key = jax.random.PRNGKey(0)
    keys = jax.random.split(key, 8)

    # 1) Default module params on a small NCHW image batch (f32, lane-aligned,
    #    multi-block kernel path).
    shape = (2, 4, 16, 16)                       # 2048 elems -> 16 rows -> 2 blocks
    a = jax.random.normal(keys[0], shape, dtype=jnp.float32) * 5.0
    b = jax.random.normal(keys[1], shape, dtype=jnp.float32) * 5.0
    loss = jax.block_until_ready(custom_mae_loss(a, b, alpha=1.0, beta=1.0))
    ref = _ref_loss(a, b, 1.0, 1.0)
    assert jnp.allclose(loss, ref, rtol=1e-5, atol=1e-6), (loss, ref)

    # 2) bf16 inputs, lane-aligned, integer beta -> exp-by-squaring path and
    #    bf16-aware block sizing.
    shape2 = (4, 8, 8, 16)                       # 4096 elems -> 32 rows -> 4 blocks
    c = (jax.random.normal(keys[2], shape2, dtype=jnp.float32) * 3.0).astype(jnp.bfloat16)
    d = (jax.random.normal(keys[3], shape2, dtype=jnp.float32) * 3.0).astype(jnp.bfloat16)
    loss2 = jax.block_until_ready(custom_mae_loss(c, d, alpha=0.5, beta=2.0))
    ref2 = _ref_loss(c, d, 0.5, 2.0)
    assert jnp.allclose(loss2, ref2, rtol=1e-5, atol=1e-6), (loss2, ref2)

    # 3) Non-integer (half-integer) beta -> sqrt decomposition, plus ragged
    #    rows: 20 rows = 2 full blocks of 8 + 4 leftover rows in the JAX tail.
    e = jax.random.normal(keys[4], (20 * _LANES,), dtype=jnp.float32) * 2.0
    f = jax.random.normal(keys[5], (20 * _LANES,), dtype=jnp.float32) * 2.0
    loss3 = jax.block_until_ready(custom_mae_loss(e, f, alpha=2.0, beta=1.5))
    ref3 = _ref_loss(e, f, 2.0, 1.5)
    assert jnp.allclose(loss3, ref3, rtol=1e-5, atol=1e-6), (loss3, ref3)

    # 4) Non-lane-aligned element count -> fused XLA fallback (reads inputs
    #    once; no hidden full-array slice copy feeding the kernel).
    g = jax.random.normal(keys[6], (3, 5, 7, 11), dtype=jnp.float32)
    h = jax.random.normal(keys[7], (3, 5, 7, 11), dtype=jnp.float32)
    loss4 = jax.block_until_ready(custom_mae_loss(g, h, alpha=1.0, beta=3.0))
    ref4 = _ref_loss(g, h, 1.0, 3.0)
    assert jnp.allclose(loss4, ref4, rtol=1e-5, atol=1e-6), (loss4, ref4)

    print("KERNEL_OK")
</pallas_src>

<mosaic_0001>
module attributes {stable_mosaic.version = 11 : i64} {
  func.func @_mae_partial_kernel(%arg0: i32, %arg1: memref<8x128xf32, #tpu.memory_space<vmem>>, %arg2: memref<8x128xf32, #tpu.memory_space<vmem>>, %arg3: memref<1x8x128xf32, #tpu.memory_space<vmem>>) attributes {dimension_semantics = [#tpu.dimension_semantics<parallel>], iteration_bounds = array<i64: 2>, scalar_prefetch = 0 : i64, scratch_operands = 0 : i64, tpu.core_type = #tpu.core_type<tc>, window_params = [{transform_indices = @transform_0, window_bounds = array<i64: 8, 128>}, {transform_indices = @transform_1, window_bounds = array<i64: 8, 128>}, {transform_indices = @transform_2, window_bounds = array<i64: 1, 8, 128>}]} {
    %c0 = arith.constant 0 : index
    %c0_0 = arith.constant 0 : index
    %0 = vector.load %arg1[%c0, %c0_0] : memref<8x128xf32, #tpu.memory_space<vmem>>, vector<8x128xf32>
    %c0_1 = arith.constant 0 : index
    %c0_2 = arith.constant 0 : index
    %1 = vector.load %arg2[%c0_1, %c0_2] : memref<8x128xf32, #tpu.memory_space<vmem>>, vector<8x128xf32>
    %2 = arith.subf %0, %1 : vector<8x128xf32>
    %3 = math.absf %2 : vector<8x128xf32>
    %cst = arith.constant 1.000000e+04 : f32
    %4 = vector.broadcast %cst : f32 to vector<8x128xf32>
    %5 = arith.minimumf %3, %4 : vector<8x128xf32>
    %6 = vector.shape_cast %5 : vector<8x128xf32> to vector<1x8x128xf32>
    %cst_3 = arith.constant dense<0.000000e+00> : vector<8x128xf32>
    %7 = vector.multi_reduction <add>, %6, %cst_3 [0] : vector<1x8x128xf32> to vector<8x128xf32>
    %8 = vector.shape_cast %7 : vector<8x128xf32> to vector<1x8x128xf32>
    %c0_4 = arith.constant 0 : index
    %c0_5 = arith.constant 0 : index
    %c0_6 = arith.constant 0 : index
    %9 = vector.load %arg3[%c0_4, %c0_5, %c0_6] : memref<1x8x128xf32, #tpu.memory_space<vmem>>, vector<1x8x128xf32>
    tpu.vector_store %arg3[%c0_4, %c0_5, %c0_6], %8 {strides = array<i32>} : memref<1x8x128xf32, #tpu.memory_space<vmem>>, vector<1x8x128xf32>,
    return
  }
  func.func @transform_0(%arg0: i32) -> (i32, i32) {
    %c0_i32 = arith.constant 0 : i32
    %c0_i32_0 = arith.constant 0 : i32
    return %arg0, %c0_i32 : i32, i32
  }
  func.func @transform_1(%arg0: i32) -> (i32, i32) {
    %c0_i32 = arith.constant 0 : i32
    %c0_i32_0 = arith.constant 0 : i32
    return %arg0, %c0_i32 : i32, i32
  }
  func.func @transform_2(%arg0: i32) -> (i32, i32, i32) {
    %c0_i32 = arith.constant 0 : i32
    %c0_i32_0 = arith.constant 0 : i32
    %c0_i32_1 = arith.constant 0 : i32
    return %arg0, %c0_i32, %c0_i32_0 : i32, i32, i32
  }
}

</mosaic_0001>

<bundles_post_ra>
// kernel: tpu_custom_call.1
= control target key start
LH: loop header
LB: loop body
LE: loop exit
PB: predicated region body
PF: predicated region fallthrough
CT: control target
= control target key end

     0   :  { %7 = vsyncpa [#allocation3], 0  ;;  %s735_s0 = inlined_call_operand.hbm [shape: f32[16,128], index: 0, kind: input, shape index: {}]   ;;  %s736_s1 = inlined_call_operand.hbm [shape: f32[16,128], index: 1, kind: input, shape index: {}]   ;;  %s737_s2 = inlined_call_operand.hbm [shape: f32[2,8,128], index: 2, kind: output, shape index: {}]  }
   0x1   :  { %9 = vsyncpa [#allocation3 + $0x1], 0 }
   0x2   :  { %10 = vsyncpa [#allocation6], 0 }
   0x3   :  { %12 = vsyncpa [#allocation6 + $0x1], 0 }
   0x4   :  { %13 = vsyncpa [#allocation4], 0 }
   0x5   :  { %15 = vsyncpa [#allocation4 + $0x1], 0  ;;  %s526_s9 = smov 0   ;;  %s528_s10 = smov 0  }
   0x6   :  { %s530_s11 = smov 0   ;;  %s532_s12 = smov 0  }
   0x7 LB: > { %s547_s13 = sadd.s32 4294967295, %s506_s12   ;;  %s310_s14 = sadd.s32 4294967294, %s506_s12   ;;  %s506_s12 = sphi %s532_s12, %s756_s12   ;;  %s502_s11 = sphi %s530_s11, %s755_s11   ;;  %s498_s10 = sphi %s528_s10, %s754_s10   ;;  %s494_s9 = sphi %s526_s9, %s753_s9  }
   0x8   : > { %s551_s15 = sadd.s32 1, %s506_s12   ;;  %s28_s16 = sadd.s32 1, %s502_s11 }
   0x9   : > { %s25_s17 = ssub.s32 %s506_s12, %s551_s15  ;;  %p35_p0 = scmp.ne.s32.totalorder %s502_s11, %s498_s10 }
   0xa   : > { %p26_p1 = scmp.eq.s32.totalorder %s25_s17, 0  ;;  %p36_p2 = scmp.eq.s32.totalorder %s506_s12, 0 }
   0xb   : > { %p41_p3 = scmp.ne.s32.totalorder %s498_s10, %s494_s9  ;;  %p42_p4 = scmp.eq.s32.totalorder %s547_s13, 0 }
   0xc   : > { %s563_s18 = scalar_select %p26_p1, %s502_s11, %s28_s16  }
   0xd   : > { %p565_p5 = por %p36_p2, %p35_p0  ;;  %p569_p6 = por %p42_p4, %p41_p3 }
   0xe   : > { %p91_p7 = scmp.eq.s32.totalorder %s547_s13, 1  ;;  %p97_p8 = scmp.eq.s32.totalorder %s310_s14, 1 }
   0xf   : > { %s741_s20 = scalar_select %p569_p6, 1, 0 }
  0x10   : > { %p342_p10 = scmp.lt.s32.totalorder %s506_s12, 2  ;;  %p576_p11 = por %p91_p7, %p35_p0 }
  0x11   : > { %p580_p12 = por %p97_p8, %p41_p3  ;;  %s585_s23 = sand.u32 1, %s502_s11  }
  0x12   : > { %s742_s21 = scalar_select %p576_p11, 1, 0 }
  0x13   : > { %s743_s22 = scalar_select %p580_p12, 1, 0 }
  0x14   : > { %s314_s24 = sshll.u32 %s506_s12, 7  ;;  %s313_s25 = sshll.u32 %s585_s23, 3 }
  0x15   : > { %s594_s28 = scalar_lea.hbm %s735_s0, %s314_s24  ;;  %s121_s29 = scalar_lea.vmem [#allocation2], %s313_s25 }
  0x16   : > { %s128_s30 = sshll.u32 %s121_s29, 4  ;;  %p600_p13 = pnand %p342_p10, %p565_p5  ;;  %s604_s30 = int_to_ptr.vmem [resolvable:$true] %s128_s30 }
  0x17   : > { %s118_s4 = scalar_lea.sflag [#allocation3], %s585_s23  ;;  %s376_s5 = scalar_lea.hbm %s594_s28, 128 }
  0x18   : > { %p377_p2 = scmp.ne.s32.totalorder %s594_s28, %s376_s5  ;;  %p378_p3 = pneg %p600_p13 }
  0x19   : > { %s381_s8 = scalar_lea.hbm %s735_s0, 256  ;;  %p382_p5 = scmp.lt.u32.totalorder %s594_s28, %s735_s0 }
  0x1a   : > { %p379_p4 = pnand %p378_p3, %p377_p2  ;;  %p383_p8 = scmp.lt.u32.totalorder %s381_s8, %s376_s5 }
  0x1b   : > { %p385_p9 = scmp.lt.u32.totalorder %s376_s5, %s594_s28 }
  0x1c   : > { %p380_p7 = pneg %p379_p4  ;;  %p384_p10 = por %p383_p8, %p382_p5 }
  0x1e   : > { %p386_p0 = por %p385_p9, %p384_p10 }
  0x20   : > { %p387_p1 = pnand %p386_p0, %p380_p7 }
  0x22   : > { %390 = shalt.err (!%p387_p1)
}
  0x23   : > { %s391_s17 = scalar_lea.vmem %s604_s30, 128  ;;  %s508_s19 = smov [#allocation2]  }
  0x24   : > { %p392_p2 = scmp.ne.s32.totalorder %s604_s30, %s391_s17  ;;  %s396_s26 = sshll.u32 %s508_s19, 4  ;;  %s397_s26 = int_to_ptr.vmem [resolvable:$false] %s396_s26 }
  0x25   : > { %s398_s27 = scalar_lea.vmem %s397_s26, 256  ;;  %p399_p11 = scmp.lt.s32.totalorder %s604_s30, %s397_s26 }
  0x26   : > { %p394_p4 = pnand %p392_p2, %p378_p3  ;;  %p400_p5 = scmp.lt.s32.totalorder %s398_s27, %s391_s17 }
  0x28   : > { %p395_p12 = pneg %p394_p4  ;;  %p401_p8 = por %p400_p5, %p399_p11 }
  0x2a   : > { %p402_p9 = pnand %p401_p8, %p395_p12 }
  0x2c   : > { %405 = shalt.err (!%p402_p9)
}
  0x2d   : > { %334 = dma.hbm_to_vmem [thread:$0]  (!%p600_p13), %s594_s28, 128, %s604_s30, %s118_s4  }
  0x2e   : > { %p745_p0 = scmp.lt.s32.totalorder %s506_s12, 3  ;;  %p746_p1 = scmp.ge.s32.totalorder %s506_s12, 1 }
  0x2f   : > { %s647_s7 = scalar_lea.hbm %s736_s1, %s314_s24  ;;  %s139_s8 = scalar_lea.vmem [#allocation5], %s313_s25 }
  0x30   : > { %p638_p7 = pnand %p746_p1, %p745_p0  ;;  %s146_s14 = sshll.u32 %s139_s8, 4  ;;  %s147_s14 = int_to_ptr.vmem [resolvable:$true] %s146_s14 }
  0x31   : > { %s136_s28 = scalar_lea.sflag [#allocation6], %s585_s23  ;;  %s406_s30 = scalar_lea.hbm %s647_s7, 128 }
  0x32   : > { %s747_s29 = scalar_select %p638_p7, 1, 0 }
  0x33   : > { %p407_p11 = scmp.ne.s32.totalorder %s647_s7, %s406_s30  ;;  %s411_s24 = scalar_lea.hbm %s736_s1, 256 }
  0x34   : > { %p412_p2 = scmp.lt.u32.totalorder %s647_s7, %s736_s1  ;;  %p413_p4 = scmp.lt.u32.totalorder %s411_s24, %s406_s30 }
  0x35   : > { %p409_p12 = pnand %p407_p11, %p378_p3  ;;  %p415_p8 = scmp.lt.u32.totalorder %s406_s30, %s647_s7 }
  0x36   : > { %p414_p5 = por %p413_p4, %p412_p2 }
  0x37   : > { %p410_p10 = pneg %p409_p12 }
  0x38   : > { %p416_p9 = por %p415_p8, %p414_p5 }
  0x3a   : > { %p417_p0 = pnand %p416_p9, %p410_p10 }
  0x3c   : > { %420 = shalt.err (!%p417_p0)
}
  0x3d   : > { %s421_s23 = scalar_lea.vmem %s147_s14, 128  ;;  %s509_s25 = smov [#allocation5]  }
  0x3e   : > { %p422_p1 = scmp.ne.s32.totalorder %s147_s14, %s421_s23  ;;  %s426_s26 = sshll.u32 %s509_s25, 4  ;;  %s427_s26 = int_to_ptr.vmem [resolvable:$false] %s426_s26 }
  0x3f   : > { %s428_s27 = scalar_lea.vmem %s427_s26, 256  ;;  %p429_p6 = scmp.lt.s32.totalorder %s147_s14, %s427_s26 }
  0x40   : > { %p424_p11 = pnand %p422_p1, %p378_p3  ;;  %p430_p7 = scmp.lt.s32.totalorder %s428_s27, %s421_s23 }
  0x42   : > { %p425_p12 = pneg %p424_p11  ;;  %p431_p2 = por %p430_p7, %p429_p6 }
  0x44   : > { %p432_p4 = pnand %p431_p2, %p425_p12 }
  0x46   : > { %435 = shalt.err (!%p432_p4)
}
  0x47   : > { %337 = dma.hbm_to_vmem [thread:$0]  (!%p600_p13), %s647_s7, 128, %s147_s14, %s136_s28  }
  0x48   : > { %p748_p10 = scmp.ne.s32.totalorder %s747_s29, 0 }
  0x49   : > { %s674_s5 = sand.u32 (!%p748_p10), 1, %s498_s10   ;;  %p749_p3 = scmp.ne.s32.totalorder (!%p748_p10), %s741_s20, 0 }
  0x4a   : > { %155 = sbr.rel (%p748_p10) target bundleno = 110 (0x6e), region = 28  ;;  %s318_s6 = sshll.u32 (!%p748_p10), %s674_s5, 3 }
  0x4b   : > { %s158_s8 = scalar_lea.sflag (!%p748_p10), [#allocation3], %s674_s5  ;;  %s161_s30 = scalar_lea.vmem (!%p748_p10), [#allocation2], %s318_s6 }
  0x51   : > { %481 = dma.done.wait (%p749_p3), %s158_s8, 128  }
  0x52   : > { %483 = vsyncadd (%p749_p3), %s158_s8, 4294967168  ;;  %s167_s3 = scalar_lea.sflag [#allocation6], %s674_s5  ;;  %s170_s7 = scalar_lea.vmem [#allocation5], %s318_s6 }
  0x53   : > { %485 = dma.done.wait (%p749_p3), %s167_s3, 128  }
  0x54   : > { %487 = vsyncadd (%p749_p3), %s167_s3, 4294967168  ;;  %v196_v0 = vld [vmem:[%s161_s30] sm:$0xff]  ;;  %v197_v1 = vld [vmem:[%s170_s7] sm:$0xff]  ;;  %s195_s29 = scalar_lea.vmem [#allocation7], %s318_s6  ;;  %s322_s28 = sshll.u32 %s547_s13, 7 }
  0x55   : > { %v198_v2 = vsub.f32 %v196_v0, %v197_v1  ;;  %s217_s14 = sshll.u32 %s195_s29, 4  ;;  %s693_s20 = scalar_lea.hbm %s737_s2, %s322_s28  ;;  %s688_s14 = int_to_ptr.vmem [resolvable:$true] %s217_s14 }
  0x56   : > { %s204_s24 = scalar_lea.sflag [#allocation4], %s674_s5  ;;  %s436_s17 = scalar_lea.vmem %s688_s14, 128 }
  0x57   : > { %v199_v3 = vand.u32 2147483647, %v198_v2  ;;  %p437_p6 = scmp.ne.s32.totalorder %s688_s14, %s436_s17  ;;  %p750_p13 = scmp.ne.s32.totalorder %s742_s21, 0 }
  0x58   : > { %s510_s13 = smov [#allocation7]  }
  0x59   : > { %v200_v4 = vmin.f32 %v199_v3, 10000.0  ;;  %p438_p7 = pnand %p437_p6, %p750_p13  ;;  %s440_s19 = sshll.u32 %s510_s13, 4  ;;  %s441_s19 = int_to_ptr.vmem [resolvable:$false] %s440_s19 }
  0x5a   : > { %s442_s23 = scalar_lea.vmem %s441_s19, 256  ;;  %p443_p8 = scmp.lt.s32.totalorder %s688_s14, %s441_s19 }
  0x5b   : > { %202 = vst [vmem:[%s195_s29] sm:$0xff] %v200_v4  ;;  %p439_p5 = pneg %p438_p7  ;;  %p444_p9 = scmp.lt.s32.totalorder %s442_s23, %s436_s17 }
  0x5d   : > { %p445_p0 = por %p444_p9, %p443_p8 }
  0x5f   : > { %p446_p1 = pnand %p445_p0, %p439_p5 }
  0x61   : > { %449 = shalt.err (!%p446_p1)
}
  0x62   : > { %s450_s25 = scalar_lea.hbm %s693_s20, 128  ;;  %s454_s5 = scalar_lea.hbm %s737_s2, 256 }
  0x63   : > { %p451_p11 = scmp.ne.s32.totalorder %s693_s20, %s450_s25  ;;  %p455_p4 = scmp.lt.u32.totalorder %s693_s20, %s737_s2 }
  0x64   : > { %p456_p10 = scmp.lt.u32.totalorder %s454_s5, %s450_s25  ;;  %p458_p6 = scmp.lt.u32.totalorder %s450_s25, %s693_s20 }
  0x65   : > { %p452_p12 = pnand %p451_p11, %p750_p13 }
  0x66   : > { %p457_p3 = por %p456_p10, %p455_p4 }
  0x67   : > { %p453_p2 = pneg %p452_p12 }
  0x68   : > { %p459_p7 = por %p458_p6, %p457_p3 }
  0x6a   : > { %p460_p5 = pnand %p459_p7, %p453_p2 }
  0x6c   : > { %463 = shalt.err (!%p460_p5)
}
  0x6d   : > { %329 = dma.vmem_to_hbm [thread:$0]  (%p750_p13), %s688_s14, 128, %s693_s20, %s204_s24  }
  0x6e PF: > { %s229_s30 = sand.u32 1, %s494_s9   ;;  %p751_p8 = scmp.ne.s32.totalorder %s743_s22, 0 }
  0x6f   : > { %p752_p9 = scmp.ge.s32.totalorder %s506_s12, 2  ;;  %s230_s3 = scalar_lea.sflag [#allocation4], %s229_s30 }
  0x71   : > { %p339_p0 = pnand %p752_p9, %p751_p8 }
  0x73   : > { %489 = dma.done.wait (!%p339_p0), %s230_s3, 128  }
  0x74   : > { %491 = vsyncadd (!%p339_p0), %s230_s3, 4294967168  ;;  %p18_p1 = scmp.ge.s32.totalorder %s551_s15, 4   ;;  %s753_s9 = smov %s498_s10 }
  0x75   : > { %s754_s10 = smov %s502_s11  ;;  %s755_s11 = smov %s563_s18 }
  0x76   : > { %s756_s12 = smov %s551_s15  ;;  %20 = sbr.rel (!%p18_p1) target bundleno = 7 (0x7), region = 86 }
  0x7d   :  { %235 = vsyncpa [#allocation3], 1 }
  0x7e   :  { %237 = vsyncpa [#allocation3 + $0x1], 1 }
  0x7f   :  { %238 = vsyncpa [#allocation6], 1 }
  0x80   :  { %240 = vsyncpa [#allocation6 + $0x1], 1 }
  0x81   :  { %241 = vsyncpa [#allocation4], 1 }
  0x82   :  { %243 = vsyncpa [#allocation4 + $0x1], 1 }

</bundles_post_ra>
